<compile_context>
chip_gen: v7x
topology: tpu7x:2x2x1
jax: 0.10.0
libtpu: 0.0.40
codegen_flags: <defaults>
</compile_context>

<pallas_src>
import functools

import jax
import jax.numpy as jnp
from jax.experimental import pallas as pl
from jax.experimental.pallas import tpu as pltpu


def _round_up(v: int, m: int) -> int:
    return (v + m - 1) // m * m


def _make_kernel(mm_dtype):
    def kernel(w_ref, bias_ref, x_ref, o_ref):
        # w_ref:    (C_out, C_in)  folded weight, VMEM-resident
        # bias_ref: (C_out, 1)     folded bias (f32)
        # x_ref:    (C_in, hw_tile) activation tile (batch dim squeezed)
        # o_ref:    (C_out, hw_tile)
        x = x_ref[...].astype(mm_dtype)
        y = jnp.dot(w_ref[...], x, preferred_element_type=jnp.float32)
        y = y + bias_ref[...]                      # lane-broadcast bias add
        o_ref[...] = jnp.maximum(y, 0.0).astype(o_ref.dtype)

    return kernel


@functools.partial(jax.jit, static_argnames=("stride", "eps", "bf16_matmul"))
def conv1x1_bn_relu(
    x: jax.Array,             # (N, C_in, H, W)  NCHW, like PyTorch
    weight: jax.Array,        # (C_out, C_in, 1, 1)
    gamma: jax.Array,         # (C_out,)
    beta: jax.Array,          # (C_out,)
    running_mean: jax.Array,  # (C_out,)
    running_var: jax.Array,   # (C_out,)
    *,
    stride: int = 1,
    eps: float = 1e-5,
    bf16_matmul: bool = True,
) -> jax.Array:
    n, c_in, h, w = x.shape
    c_out = weight.shape[0]

    # A strided 1x1 conv (padding=0) is plain spatial subsampling.
    if stride != 1:
        x = x[:, :, ::stride, ::stride]
        h, w = x.shape[2], x.shape[3]
    hw = h * w

    out_dtype = x.dtype
    mm_dtype = (
        jnp.bfloat16 if (bf16_matmul and x.dtype == jnp.float32) else x.dtype
    )

    # ---- Fold BatchNorm (eval) into the conv weight / bias ------------------
    scale = gamma.astype(jnp.float32) * jax.lax.rsqrt(
        running_var.astype(jnp.float32) + eps
    )                                                             # (C_out,)
    w_folded = (
        weight.reshape(c_out, c_in).astype(jnp.float32) * scale[:, None]
    ).astype(mm_dtype)                                            # (C_out, C_in)
    bias = (
        beta.astype(jnp.float32) - running_mean.astype(jnp.float32) * scale
    ).reshape(c_out, 1)                                           # (C_out, 1) f32

    # Free reshape: NCHW contiguous -> (N, C_in, H*W); no HBM copy.
    x3 = x.reshape(n, c_in, hw)

    # ---- hw tile: 128-multiple, sized for a ~24 MiB double-buffered budget ---
    in_item = jnp.dtype(x.dtype).itemsize
    out_item = jnp.dtype(out_dtype).itemsize
    w_bytes = 2 * c_out * c_in * jnp.dtype(mm_dtype).itemsize     # (2-buffered)
    budget = 24 * 1024 * 1024 - w_bytes
    per_col = 2 * (c_in * in_item + c_out * out_item)             # x + out, 2-buf
    hw_tile = max(128, (budget // per_col) // 128 * 128)
    hw_tile = min(hw_tile, _round_up(hw, 128), 8192)

    grid = (n, pl.cdiv(hw, hw_tile))

    out = pl.pallas_call(
        _make_kernel(mm_dtype),
        out_shape=jax.ShapeDtypeStruct((n, c_out, hw), out_dtype),
        grid=grid,
        in_specs=[
            # Folded weight / bias: constant index_map -> VMEM-resident.
            pl.BlockSpec((c_out, c_in), lambda b, t: (0, 0)),
            pl.BlockSpec((c_out, 1), lambda b, t: (0, 0)),
            # Activations, streamed once, batch dim squeezed.
            pl.BlockSpec((None, c_in, hw_tile), lambda b, t: (b, 0, t)),
        ],
        out_specs=pl.BlockSpec((None, c_out, hw_tile), lambda b, t: (b, 0, t)),
        compiler_params=pltpu.CompilerParams(
            dimension_semantics=("parallel", "parallel"),
            vmem_limit_bytes=40 * 1024 * 1024,
        ),
        cost_estimate=pl.CostEstimate(
            flops=2 * n * c_out * c_in * hw,
            transcendentals=0,
            bytes_accessed=(
                x3.size * in_item
                + n * c_out * hw * out_item
                + w_folded.size * jnp.dtype(mm_dtype).itemsize
                + bias.size * 4
            ),
        ),
    )(w_folded, bias, x3)

    # Free reshape back to NCHW.
    return out.reshape(n, c_out, h, w)


def _reference(x, weight, gamma, beta, mean, var, *, stride=1, eps=1e-5):
    """Pure-JAX reference: conv1x1 (stride) -> BN (eval) -> ReLU, NCHW."""
    if stride != 1:
        x = x[:, :, ::stride, ::stride]
    c_out, c_in = weight.shape[0], weight.shape[1]
    w2d = weight.reshape(c_out, c_in).astype(jnp.float32)
    y = jnp.einsum("nchw,oc->nohw", x.astype(jnp.float32), w2d)
    scale = gamma / jnp.sqrt(var + eps)
    shift = beta - mean * scale
    y = y * scale[None, :, None, None] + shift[None, :, None, None]
    return jnp.maximum(y, 0.0).astype(x.dtype)


if __name__ == "__main__":
    key = jax.random.PRNGKey(0)
    k_x, k_w, k_g, k_b, k_m, k_v = jax.random.split(key, 6)

    N, C, H, W = 2, 4, 16, 16

    x = jax.random.normal(k_x, (N, C, H, W), dtype=jnp.float32)
    weight = jax.random.normal(k_w, (C, C, 1, 1), dtype=jnp.float32) * 0.5
    gamma = jax.random.normal(k_g, (C,), dtype=jnp.float32) * 0.1 + 1.0
    beta = jax.random.normal(k_b, (C,), dtype=jnp.float32) * 0.1
    running_mean = jax.random.normal(k_m, (C,), dtype=jnp.float32) * 0.1
    running_var = jnp.abs(jax.random.normal(k_v, (C,), dtype=jnp.float32)) + 0.5

    # Full-f32 matmul path: tight tolerance vs f32 reference.
    y32 = conv1x1_bn_relu(
        x, weight, gamma, beta, running_mean, running_var,
        stride=1, bf16_matmul=False,
    )
    jax.block_until_ready(y32)
    ref = _reference(x, weight, gamma, beta, running_mean, running_var, stride=1)
    assert y32.shape == ref.shape and y32.dtype == x.dtype
    assert jnp.allclose(y32, ref, rtol=1e-4, atol=1e-4), (
        float(jnp.max(jnp.abs(y32 - ref)))
    )

    # Default bf16-operand path (f32 accumulation): bf16-level tolerance.
    y16 = conv1x1_bn_relu(
        x, weight, gamma, beta, running_mean, running_var, stride=1
    )
    jax.block_until_ready(y16)
    assert jnp.allclose(y16, ref, rtol=5e-2, atol=5e-2), (
        float(jnp.max(jnp.abs(y16 - ref)))
    )

    # Stride-2 path (also exercises the partial hw-tile writeback).
    y_s2 = conv1x1_bn_relu(
        x, weight, gamma, beta, running_mean, running_var, stride=2
    )
    jax.block_until_ready(y_s2)
    ref_s2 = _reference(
        x, weight, gamma, beta, running_mean, running_var, stride=2
    )
    assert y_s2.shape == ref_s2.shape
    assert jnp.allclose(y_s2, ref_s2, rtol=5e-2, atol=5e-2), (
        float(jnp.max(jnp.abs(y_s2 - ref_s2)))
    )

    print("KERNEL_OK")
</pallas_src>

<mosaic_0001>
module attributes {stable_mosaic.version = 11 : i64} {
  func.func @kernel(%arg0: i32, %arg1: i32, %arg2: memref<4x4xf32, #tpu.memory_space<vmem>>, %arg3: memref<4x1xf32, #tpu.memory_space<vmem>>, %arg4: memref<1x4x256xf32, #tpu.memory_space<vmem>>, %arg5: memref<1x4x256xf32, #tpu.memory_space<vmem>>) attributes {dimension_semantics = [#tpu.dimension_semantics<parallel>, #tpu.dimension_semantics<parallel>], iteration_bounds = array<i64: 2, 1>, scalar_prefetch = 0 : i64, scratch_operands = 0 : i64, tpu.core_type = #tpu.core_type<tc>, window_params = [{pipeline_mode = #tpu.pipeline_mode<synchronous>, transform_indices = @transform_0, window_bounds = array<i64: 4, 4>}, {pipeline_mode = #tpu.pipeline_mode<synchronous>, transform_indices = @transform_1, window_bounds = array<i64: 4, 1>}, {transform_indices = @transform_2, window_bounds = array<i64: 1, 4, 256>}, {transform_indices = @transform_3, window_bounds = array<i64: 1, 4, 256>}]} {
    %c0 = arith.constant 0 : index
    %c0_0 = arith.constant 0 : index
    %c0_1 = arith.constant 0 : index
    %0 = vector.load %arg4[%c0, %c0_0, %c0_1] : memref<1x4x256xf32, #tpu.memory_space<vmem>>, vector<1x4x256xf32>
    %1 = vector.shape_cast %0 : vector<1x4x256xf32> to vector<4x256xf32>
    %c0_2 = arith.constant 0 : index
    %c0_3 = arith.constant 0 : index
    %2 = vector.load %arg2[%c0_2, %c0_3] : memref<4x4xf32, #tpu.memory_space<vmem>>, vector<4x4xf32>
    %cst = arith.constant dense<0.000000e+00> : vector<4x256xf32>
    %3 = tpu.matmul %2, %1, %cst {dimension_numbers = #tpu.dot_dimension_numbers<[1], [0], [0], [1], [0, 0, 1, 1], [], []>} : vector<4x4xf32>, vector<4x256xf32>, vector<4x256xf32> -> vector<4x256xf32>
    %c0_4 = arith.constant 0 : index
    %c0_5 = arith.constant 0 : index
    %4 = vector.load %arg3[%c0_4, %c0_5] : memref<4x1xf32, #tpu.memory_space<vmem>>, vector<4x1xf32>
    %5 = vector.broadcast %4 : vector<4x1xf32> to vector<4x256xf32>
    %6 = arith.addf %3, %5 : vector<4x256xf32>
    %cst_6 = arith.constant 0.000000e+00 : f32
    %7 = vector.broadcast %cst_6 : f32 to vector<4x256xf32>
    %8 = arith.maximumf %6, %7 : vector<4x256xf32>
    %c0_7 = arith.constant 0 : index
    %c0_8 = arith.constant 0 : index
    %c0_9 = arith.constant 0 : index
    %9 = vector.load %arg5[%c0_7, %c0_8, %c0_9] : memref<1x4x256xf32, #tpu.memory_space<vmem>>, vector<1x4x256xf32>
    %10 = vector.shape_cast %9 : vector<1x4x256xf32> to vector<4x256xf32>
    %11 = vector.shape_cast %8 : vector<4x256xf32> to vector<1x4x256xf32>
    tpu.vector_store %arg5[%c0_7, %c0_8, %c0_9], %11 {strides = array<i32>} : memref<1x4x256xf32, #tpu.memory_space<vmem>>, vector<1x4x256xf32>,
    return
  }
  func.func @transform_0(%arg0: i32, %arg1: i32) -> (i32, i32) {
    %c0_i32 = arith.constant 0 : i32
    %c0_i32_0 = arith.constant 0 : i32
    %c0_i32_1 = arith.constant 0 : i32
    return %c0_i32, %c0_i32_0 : i32, i32
  }
  func.func @transform_1(%arg0: i32, %arg1: i32) -> (i32, i32) {
    %c0_i32 = arith.constant 0 : i32
    %c0_i32_0 = arith.constant 0 : i32
    %c0_i32_1 = arith.constant 0 : i32
    return %c0_i32, %c0_i32_0 : i32, i32
  }
  func.func @transform_2(%arg0: i32, %arg1: i32) -> (i32, i32, i32) {
    %c0_i32 = arith.constant 0 : i32
    %c0_i32_0 = arith.constant 0 : i32
    return %arg0, %c0_i32, %arg1 : i32, i32, i32
  }
  func.func @transform_3(%arg0: i32, %arg1: i32) -> (i32, i32, i32) {
    %c0_i32 = arith.constant 0 : i32
    %c0_i32_0 = arith.constant 0 : i32
    return %arg0, %c0_i32, %arg1 : i32, i32, i32
  }
}

</mosaic_0001>

<bundles_post_ra>
// kernel: conv1x1_bn_relu.1
= control target key start
LH: loop header
LB: loop body
LE: loop exit
PB: predicated region body
PF: predicated region fallthrough
CT: control target
= control target key end

     0   :  { %s484_s12 = smov 0   ;;  %s486_s13 = smov 0   ;;  %s523_s0 = inlined_call_operand.vmem [shape: f32[4,4], index: 0, kind: input, shape index: {}]   ;;  %s524_s1 = inlined_call_operand.vmem [shape: f32[4,1], index: 1, kind: input, shape index: {}]   ;;  %s525_s2 = inlined_call_operand.vmem [shape: f32[2,4,256], index: 2, kind: input, shape index: {}]   ;;  %s526_s3 = inlined_call_operand.vmem [shape: f32[2,4,256], index: 3, kind: output, shape index: {}]  }
   0x1   :  { %s488_s14 = smov 0  }
   0x2 LB: > { %s25_s15 = sadd.s32 1, %s456_s13  ;;  %p398_p0 = scmp.ge.s32.totalorder %s460_s14, 1  ;;  %s460_s14 = sphi %s488_s14, %s13_s14   ;;  %s456_s13 = sphi %s486_s13, %s528_s13   ;;  %s452_s12 = sphi %s484_s12, %s527_s12  }
   0x3   : > { %p27_p1 = scmp.ge.s32.totalorder %s25_s15, 2  ;;  %p158_p2 = scmp.lt.s32.totalorder %s460_s14, 3 }
   0x5   : > { %s530_s15 = smov (%p27_p1, %s25_s15), 0  ;;  %p159_p3 = pnand %p398_p0, %p158_p2 }
   0x6   : > { %p191_p4 = scmp.lt.s32.totalorder (!%p159_p3), %s452_s12, 1  ;;  %v462_v0 = vmov (!%p159_p3), 0.0   ;;  %v212_v1 = vld [vmem:[%s524_s1] sm:$0xf] (!%p159_p3)  ;;  %v463_v2 = vmov (!%p159_p3), 0   ;;  %vm224_vm0 = vcmask (!%p159_p3), 1043456  }
   0x7   : > { %162 = sbr.rel (%p159_p3) target bundleno = 242 (0xf2), region = 32  ;;  %293 = vmatprep.mubr.f32.mxu0 (!%p159_p3), %v462_v0  ;;  %436 = vset.pattern.permute.xlu0 (!%p159_p3), %v463_v2  ;;  %v211_v5 = vld [vmem:[%s523_s0] sm:$0xf] (!%p159_p3)  ;;  %vm220_vm1 = vcmask (!%p159_p3), 31744  }
   0x8   : > { %215 = vperm.xlu0 (!%p159_p3), %436, %v212_v1  }
   0xe   : > { %s532_s12 = smov (!%p191_p4, %s452_s12), 1 }
   0xf   : > { %s408_s18 = sshll.u32 %s532_s12, 3 }
  0x10   : > { %s198_s21 = scalar_lea.vmem %s525_s2, %s408_s18  ;;  %s208_s26 = scalar_lea.vmem %s526_s3, %s408_s18 }
  0x11   : > { %v210_v3 = vld [vmem:[%s198_s21] sm:$0xff] }
  0x12   : > { %v219_v4 = vcombine.high %v210_v3, %v210_v3 }
  0x14   : > { %403 = vmatprep.subr.msk.mxu0 %vm224_vm0, %v219_v4 }
  0x15   : > { %404 = vmatpush1.msk.msra.mxu0 %vm224_vm0, %v210_v3 }
  0x16   : > { %405 = vmatmul.mubr.msk.f32.vlgmr.msra.gmra.mrb[0].mxu0 %vm220_vm1, %v211_v5 }
  0x87   : > { %v216_v6 = vpop.permute.xlu0 %215 }
  0xe9   : > { %v295_v7 = vpop.f32.mrb[0].mxu0 }
  0xea   : > { %v296_v8 = vadd.f32 %v295_v7, %v216_v6  ;;  %v297_v9 = vpop.f32.mrb[1].mxu0 }
  0xeb   : > { %v298_v10 = vadd.f32 %v297_v9, %v216_v6 }
  0xec   : > { %v300_v11 = vmax.f32 %v296_v8, 0.0 }
  0xed   : > { %v301_v12 = vmax.f32 %v298_v10, 0.0 }
  0xef   : > { %v304_v13 = vcombine.low %v300_v11, %v301_v12 }
  0xf1   : > { %306 = vst [vmem:[%s208_s26] sm:$0xff] %v304_v13 }
  0xf2 PF: > { %s13_s14 = sadd.s32 1, %s460_s14   ;;  %s527_s12 = smov %s456_s13 }
  0xf3   : > { %p10_p5 = scmp.ge.s32.totalorder %s13_s14, 4   ;;  %s528_s13 = smov %s530_s15 }
  0xf5   :  { %12 = sbr.rel (!%p10_p5) target bundleno = 2 (0x2), region = 62 }

</bundles_post_ra>
